<compile_context>
chip_gen: v6e
topology: v6e:2x2x1
jax: 0.10.0
libtpu: 0.0.40
codegen_flags: <defaults>
</compile_context>

<pallas_src>
import functools

import jax
import jax.numpy as jnp
from jax.experimental import pallas as pl
from jax.experimental.pallas import tpu as pltpu


# ---------------------------------------------------------------------------
# Pass 1: fused block-mask kernel (tiny, single grid step).
# ---------------------------------------------------------------------------
def _make_mask_kernel(N, H, W, block_size):
    """Kernel closed over static dims: pmask (N, H+2p, W+2p) -> fused mask."""

    def kernel(pm_ref, fm_ref):
        pm = pm_ref[...]                                  # (N, Hp, Wp), f32

        # Separable stride-1 max pool over block_size x block_size windows:
        # row (sublane) shifts first, then column (lane) shifts.
        # 2*(b-1) maxima instead of b^2-1.
        rowmax = pm[:, 0:H, :]
        for dy in range(1, block_size):
            rowmax = jnp.maximum(rowmax, pm[:, dy:dy + H, :])
        bmax = rowmax[:, :, 0:W]
        for dx in range(1, block_size):
            bmax = jnp.maximum(bmax, rowmax[:, :, dx:dx + W])
        # Keeping only the first H x W outputs also reproduces PyTorch's
        # [:-1, :-1] slice for even block_size (symmetric pad p = b // 2).

        block_mask = 1.0 - bmax                           # (N, H, W), 1 = keep

        # Global renormalization numel / sum, folded into the mask so the
        # apply pass needs no global reduction.  Guard the (vanishingly
        # unlikely) all-dropped case so we never emit inf/NaN.
        total = jnp.maximum(jnp.sum(block_mask), 1.0)
        scale = jnp.float32(N * H * W) / total
        fm_ref[...] = (block_mask * scale).astype(fm_ref.dtype)

    return kernel


# ---------------------------------------------------------------------------
# Pass 2: lane-dense tiled apply kernel.
# ---------------------------------------------------------------------------
def _apply_kernel(x_ref, m_ref, o_ref):
    # x_ref: (1, TC, TL), m_ref: (1, 1, TL) -> sublane broadcast over channels.
    o_ref[...] = (x_ref[...] * m_ref[...]).astype(o_ref.dtype)


def _pick_tiles(C, HW, itemsize, budget_bytes=4 << 20):
    """Pick (channel_tile, lane_tile) for the apply pass.

    Preference: full lane extent (lane-dense stores), then the largest legal
    channel tile whose (TC, TL) block stays within ~4 MiB, so double-buffered
    in/out tiles fit comfortably in 32 MiB scoped VMEM.  Falls back to lane
    tiling only if a single-channel row is itself too large.
    """
    c_cands = sorted({C} | {t for t in range(8, C, 8) if C % t == 0})
    l_cands = sorted({HW} | {t for t in range(128, HW, 128) if HW % t == 0})
    for tl in reversed(l_cands):          # largest lane tile first
        for tc in reversed(c_cands):      # largest channel tile that fits
            if tc * tl * itemsize <= budget_bytes:
                return tc, tl
    return c_cands[0], l_cands[0]


@functools.partial(jax.jit, static_argnames=("drop_prob", "block_size"))
def dropblock2d(x, key, *, drop_prob=0.2, block_size=7):
    """DropBlock2D forward pass (training=True, masks_in=None branch)."""
    N, C, H, W = x.shape
    HW = H * W

    # gamma = drop_prob / block_size**2 ; seed mask ~ Bernoulli(gamma)
    gamma = drop_prob / (block_size ** 2)
    seed_mask = (jax.random.uniform(key, (N, H, W)) < gamma).astype(jnp.float32)

    # Zero-pad so the mask kernel can do stride-1 "same"-style pooling with
    # static slices only.
    p = block_size // 2
    pmask = jnp.pad(seed_mask, ((0, 0), (p, p), (p, p)))
    Hp, Wp = H + 2 * p, W + 2 * p

    # bf16 inputs -> bf16 mask/apply (halves HBM bytes + vreg pressure);
    # otherwise keep f32.
    mask_dtype = x.dtype if x.dtype == jnp.bfloat16 else jnp.float32

    fused_mask = pl.pallas_call(
        _make_mask_kernel(N, H, W, block_size),
        out_shape=jax.ShapeDtypeStruct((N, H, W), mask_dtype),
        grid=(1,),
        in_specs=[pl.BlockSpec((N, Hp, Wp), lambda i: (0, 0, 0))],
        out_specs=pl.BlockSpec((N, H, W), lambda i: (0, 0, 0)),
        compiler_params=pltpu.CompilerParams(
            dimension_semantics=("arbitrary",)),
    )(pmask)

    # Lane-dense views: contiguous reshapes (effectively free under jit).
    x_flat = x.reshape(N, C, HW)
    m_flat = fused_mask.reshape(N, 1, HW)

    tc, tl = _pick_tiles(C, HW, jnp.dtype(x.dtype).itemsize)

    out_flat = pl.pallas_call(
        _apply_kernel,
        out_shape=jax.ShapeDtypeStruct((N, C, HW), x.dtype),
        grid=(N, C // tc, HW // tl),
        in_specs=[
            pl.BlockSpec((1, tc, tl), lambda n, c, l: (n, c, l)),
            pl.BlockSpec((1, 1, tl), lambda n, c, l: (n, 0, l)),
        ],
        out_specs=pl.BlockSpec((1, tc, tl), lambda n, c, l: (n, c, l)),
        compiler_params=pltpu.CompilerParams(
            dimension_semantics=("parallel", "parallel", "parallel"),
            vmem_limit_bytes=32 * 1024 * 1024),
    )(x_flat, m_flat)

    return out_flat.reshape(N, C, H, W)


# ---------------------------------------------------------------------------
# Pure-JAX reference mirroring the PyTorch forward (for the sanity check).
# ---------------------------------------------------------------------------
def _reference_dropblock2d(x, key, *, drop_prob=0.2, block_size=7):
    N, C, H, W = x.shape
    gamma = drop_prob / (block_size ** 2)
    mask = (jax.random.uniform(key, (N, H, W)) < gamma).astype(jnp.float32)
    p = block_size // 2
    pooled = jax.lax.reduce_window(
        mask, -jnp.inf, jax.lax.max,
        window_dimensions=(1, block_size, block_size),
        window_strides=(1, 1, 1),
        padding=((0, 0), (p, p), (p, p)),
    )
    pooled = jnp.maximum(pooled, 0.0)  # padding contributed -inf -> clamp to 0
    if block_size % 2 == 0:
        pooled = pooled[:, :-1, :-1]
    block_mask = 1.0 - pooled
    out = x * block_mask[:, None, :, :]
    denom = jnp.maximum(jnp.sum(block_mask), 1.0)   # same guard as the kernel
    out = out * (block_mask.size / denom)
    return out


# TODO(synk): the PyTorch module's masks_out list mutation / masks_in pop are
# host-side module state; eval-mode / drop_prob==0 passthrough is trivial and
# handled outside the kernel, so neither is translated into kernel work.

if __name__ == "__main__":
    root = jax.random.PRNGKey(0)
    k_x, k_mask = jax.random.split(root)

    N, C, H, W = 2, 4, 16, 16
    x = jax.random.normal(k_x, (N, C, H, W), dtype=jnp.float32)

    out = dropblock2d(x, k_mask, drop_prob=0.2, block_size=7)
    out = jax.block_until_ready(out)

    ref = _reference_dropblock2d(x, k_mask, drop_prob=0.2, block_size=7)
    assert out.shape == (N, C, H, W)
    assert jnp.allclose(out, ref, atol=1e-5, rtol=1e-5)

    print("KERNEL_OK")
</pallas_src>

<mosaic_0001>
module attributes {stable_mosaic.version = 11 : i64} {
  func.func @kernel(%arg0: i32, %arg1: memref<2x22x22xf32, #tpu.memory_space<vmem>>, %arg2: memref<2x16x16xf32, #tpu.memory_space<vmem>>) attributes {dimension_semantics = [#tpu.dimension_semantics<arbitrary>], iteration_bounds = array<i64: 1>, scalar_prefetch = 0 : i64, scratch_operands = 0 : i64, tpu.core_type = #tpu.core_type<tc>, window_params = [{pipeline_mode = #tpu.pipeline_mode<synchronous>, transform_indices = @transform_0, window_bounds = array<i64: 2, 22, 22>}, {pipeline_mode = #tpu.pipeline_mode<synchronous>, transform_indices = @transform_1, window_bounds = array<i64: 2, 16, 16>}]} {
    %c0 = arith.constant 0 : index
    %c0_0 = arith.constant 0 : index
    %c0_1 = arith.constant 0 : index
    %0 = vector.load %arg1[%c0, %c0_0, %c0_1] : memref<2x22x22xf32, #tpu.memory_space<vmem>>, vector<2x22x22xf32>
    %1 = vector.extract_strided_slice %0 {offsets = [0, 0, 0], sizes = [2, 16, 22], strides = [1, 1, 1]} : vector<2x22x22xf32> to vector<2x16x22xf32>
    %2 = vector.extract_strided_slice %0 {offsets = [0, 1, 0], sizes = [2, 16, 22], strides = [1, 1, 1]} : vector<2x22x22xf32> to vector<2x16x22xf32>
    %3 = arith.maximumf %1, %2 : vector<2x16x22xf32>
    %4 = vector.extract_strided_slice %0 {offsets = [0, 2, 0], sizes = [2, 16, 22], strides = [1, 1, 1]} : vector<2x22x22xf32> to vector<2x16x22xf32>
    %5 = arith.maximumf %3, %4 : vector<2x16x22xf32>
    %6 = vector.extract_strided_slice %0 {offsets = [0, 3, 0], sizes = [2, 16, 22], strides = [1, 1, 1]} : vector<2x22x22xf32> to vector<2x16x22xf32>
    %7 = arith.maximumf %5, %6 : vector<2x16x22xf32>
    %8 = vector.extract_strided_slice %0 {offsets = [0, 4, 0], sizes = [2, 16, 22], strides = [1, 1, 1]} : vector<2x22x22xf32> to vector<2x16x22xf32>
    %9 = arith.maximumf %7, %8 : vector<2x16x22xf32>
    %10 = vector.extract_strided_slice %0 {offsets = [0, 5, 0], sizes = [2, 16, 22], strides = [1, 1, 1]} : vector<2x22x22xf32> to vector<2x16x22xf32>
    %11 = arith.maximumf %9, %10 : vector<2x16x22xf32>
    %12 = vector.extract_strided_slice %0 {offsets = [0, 6, 0], sizes = [2, 16, 22], strides = [1, 1, 1]} : vector<2x22x22xf32> to vector<2x16x22xf32>
    %13 = arith.maximumf %11, %12 : vector<2x16x22xf32>
    %14 = vector.extract_strided_slice %13 {offsets = [0, 0, 0], sizes = [2, 16, 16], strides = [1, 1, 1]} : vector<2x16x22xf32> to vector<2x16x16xf32>
    %15 = vector.extract_strided_slice %13 {offsets = [0, 0, 1], sizes = [2, 16, 16], strides = [1, 1, 1]} : vector<2x16x22xf32> to vector<2x16x16xf32>
    %16 = arith.maximumf %14, %15 : vector<2x16x16xf32>
    %17 = vector.extract_strided_slice %13 {offsets = [0, 0, 2], sizes = [2, 16, 16], strides = [1, 1, 1]} : vector<2x16x22xf32> to vector<2x16x16xf32>
    %18 = arith.maximumf %16, %17 : vector<2x16x16xf32>
    %19 = vector.extract_strided_slice %13 {offsets = [0, 0, 3], sizes = [2, 16, 16], strides = [1, 1, 1]} : vector<2x16x22xf32> to vector<2x16x16xf32>
    %20 = arith.maximumf %18, %19 : vector<2x16x16xf32>
    %21 = vector.extract_strided_slice %13 {offsets = [0, 0, 4], sizes = [2, 16, 16], strides = [1, 1, 1]} : vector<2x16x22xf32> to vector<2x16x16xf32>
    %22 = arith.maximumf %20, %21 : vector<2x16x16xf32>
    %23 = vector.extract_strided_slice %13 {offsets = [0, 0, 5], sizes = [2, 16, 16], strides = [1, 1, 1]} : vector<2x16x22xf32> to vector<2x16x16xf32>
    %24 = arith.maximumf %22, %23 : vector<2x16x16xf32>
    %25 = vector.extract_strided_slice %13 {offsets = [0, 0, 6], sizes = [2, 16, 16], strides = [1, 1, 1]} : vector<2x16x22xf32> to vector<2x16x16xf32>
    %26 = arith.maximumf %24, %25 : vector<2x16x16xf32>
    %cst = arith.constant 1.000000e+00 : f32
    %27 = vector.broadcast %cst : f32 to vector<2x16x16xf32>
    %28 = arith.subf %27, %26 : vector<2x16x16xf32>
    %29 = vector.shape_cast %28 : vector<2x16x16xf32> to vector<1x2x16x16xf32>
    %cst_2 = arith.constant dense<0.000000e+00> : vector<1xf32>
    %30 = vector.multi_reduction <add>, %29, %cst_2 [1, 2, 3] : vector<1x2x16x16xf32> to vector<1xf32>
    %31 = vector.shape_cast %30 : vector<1xf32> to vector<1x1x1x1xf32>
    %32 = vector.extract %31[0, 0, 0, 0] : f32 from vector<1x1x1x1xf32>
    %cst_3 = arith.constant 1.000000e+00 : f32
    %33 = arith.maximumf %32, %cst_3 : f32
    %cst_4 = arith.constant 5.120000e+02 : f32
    %34 = arith.divf %cst_4, %33 : f32
    %35 = vector.broadcast %34 : f32 to vector<2x16x16xf32>
    %36 = arith.mulf %28, %35 : vector<2x16x16xf32>
    %c0_5 = arith.constant 0 : index
    %c0_6 = arith.constant 0 : index
    %c0_7 = arith.constant 0 : index
    %37 = vector.load %arg2[%c0_5, %c0_6, %c0_7] : memref<2x16x16xf32, #tpu.memory_space<vmem>>, vector<2x16x16xf32>
    tpu.vector_store %arg2[%c0_5, %c0_6, %c0_7], %36 {strides = array<i32>} : memref<2x16x16xf32, #tpu.memory_space<vmem>>, vector<2x16x16xf32>,
    return
  }
  func.func @transform_0(%arg0: i32) -> (i32, i32, i32) {
    %c0_i32 = arith.constant 0 : i32
    %c0_i32_0 = arith.constant 0 : i32
    %c0_i32_1 = arith.constant 0 : i32
    %c0_i32_2 = arith.constant 0 : i32
    return %c0_i32, %c0_i32_0, %c0_i32_1 : i32, i32, i32
  }
  func.func @transform_1(%arg0: i32) -> (i32, i32, i32) {
    %c0_i32 = arith.constant 0 : i32
    %c0_i32_0 = arith.constant 0 : i32
    %c0_i32_1 = arith.constant 0 : i32
    %c0_i32_2 = arith.constant 0 : i32
    return %c0_i32, %c0_i32_0, %c0_i32_1 : i32, i32, i32
  }
}

module attributes {stable_mosaic.version = 11 : i64} {
  func.func @_apply_kernel(%arg0: i32, %arg1: i32, %arg2: i32, %arg3: memref<1x4x256xf32, #tpu.memory_space<vmem>>, %arg4: memref<1x1x256xf32, #tpu.memory_space<vmem>>, %arg5: memref<1x4x256xf32, #tpu.memory_space<vmem>>) attributes {dimension_semantics = [#tpu.dimension_semantics<parallel>, #tpu.dimension_semantics<parallel>, #tpu.dimension_semantics<parallel>], iteration_bounds = array<i64: 2, 1, 1>, scalar_prefetch = 0 : i64, scratch_operands = 0 : i64, tpu.core_type = #tpu.core_type<tc>, window_params = [{transform_indices = @transform_0, window_bounds = array<i64: 1, 4, 256>}, {transform_indices = @transform_1, window_bounds = array<i64: 1, 1, 256>}, {transform_indices = @transform_2, window_bounds = array<i64: 1, 4, 256>}]} {
    %c0 = arith.constant 0 : index
    %c0_0 = arith.constant 0 : index
    %c0_1 = arith.constant 0 : index
    %0 = vector.load %arg3[%c0, %c0_0, %c0_1] : memref<1x4x256xf32, #tpu.memory_space<vmem>>, vector<1x4x256xf32>
    %c0_2 = arith.constant 0 : index
    %c0_3 = arith.constant 0 : index
    %c0_4 = arith.constant 0 : index
    %1 = vector.load %arg4[%c0_2, %c0_3, %c0_4] : memref<1x1x256xf32, #tpu.memory_space<vmem>>, vector<1x1x256xf32>
    %2 = vector.broadcast %1 : vector<1x1x256xf32> to vector<1x4x256xf32>
    %3 = arith.mulf %0, %2 : vector<1x4x256xf32>
    %c0_5 = arith.constant 0 : index
    %c0_6 = arith.constant 0 : index
    %c0_7 = arith.constant 0 : index
    %4 = vector.load %arg5[%c0_5, %c0_6, %c0_7] : memref<1x4x256xf32, #tpu.memory_space<vmem>>, vector<1x4x256xf32>
    tpu.vector_store %arg5[%c0_5, %c0_6, %c0_7], %3 {strides = array<i32>} : memref<1x4x256xf32, #tpu.memory_space<vmem>>, vector<1x4x256xf32>,
    return
  }
  func.func @transform_0(%arg0: i32, %arg1: i32, %arg2: i32) -> (i32, i32, i32) {
    %c0_i32 = arith.constant 0 : i32
    return %arg0, %arg1, %arg2 : i32, i32, i32
  }
  func.func @transform_1(%arg0: i32, %arg1: i32, %arg2: i32) -> (i32, i32, i32) {
    %c0_i32 = arith.constant 0 : i32
    %c0_i32_0 = arith.constant 0 : i32
    return %arg0, %c0_i32, %arg2 : i32, i32, i32
  }
  func.func @transform_2(%arg0: i32, %arg1: i32, %arg2: i32) -> (i32, i32, i32) {
    %c0_i32 = arith.constant 0 : i32
    return %arg0, %arg1, %arg2 : i32, i32, i32
  }
}

</mosaic_0001>

<bundles_post_ra>
// kernel: dropblock2d.3
= control target key start
LH: loop header
LB: loop body
LE: loop exit
PB: predicated region body
PF: predicated region fallthrough
CT: control target
= control target key end

     0   :  { %s466_s9 = smov 0   ;;  %s468_s10 = smov 0   ;;  %s499_s0 = inlined_call_operand.vmem [shape: f32[2,4,256], index: 0, kind: input, shape index: {}]   ;;  %s500_s1 = inlined_call_operand.vmem [shape: f32[2,1,256], index: 1, kind: input, shape index: {}]   ;;  %s501_s2 = inlined_call_operand.vmem [shape: f32[2,4,256], index: 2, kind: output, shape index: {}]  }
   0x1   :  { %s470_s11 = smov 0  }
   0x2 LB: > { %s31_s12 = sadd.s32 1, %s445_s10  ;;  %p393_p0 = scmp.ge.s32.totalorder %s449_s11, 1  ;;  %s449_s11 = sphi %s470_s11, %s12_s11   ;;  %s445_s10 = sphi %s468_s10, %s503_s10   ;;  %s441_s9 = sphi %s466_s9, %s502_s9  }
   0x3   : > { %p33_p1 = scmp.ge.s32.totalorder %s31_s12, 2  ;;  %p164_p2 = scmp.lt.s32.totalorder %s449_s11, 3 }
   0x5   : > { %s505_s12 = smov (%p33_p1, %s31_s12), 0  ;;  %p165_p3 = pnand %p393_p0, %p164_p2 }
   0x6   : > { %p211_p4 = scmp.lt.s32.totalorder (!%p165_p3), %s441_s9, 1 }
   0x7   : > { %168 = sbr.rel (%p165_p3) target bundleno = 25 (0x19), region = 28 }
   0xc   : > { %v250_v0 = vlaneseq  ;;  %s507_s9 = smov (!%p211_p4, %s441_s9), 1 }
   0xd   : > { %s401_s13 = sshll.u32 %s507_s9, 3  ;;  %s396_s14 = sshll.u32 %s507_s9, 1 }
   0xe   : > { %v251_v1 = vshrl.u32 %v250_v0, 7  ;;  %s222_s17 = scalar_lea.vmem %s499_s0, %s401_s13  ;;  %s231_s20 = scalar_lea.vmem %s500_s1, %s396_s14 }
   0xf   : > { %v248_v4 = vld [vmem:[%s231_s20] sm:$0x3]  ;;  %s245_s23 = scalar_lea.vmem %s501_s2, %s401_s13 }
  0x10   : > { %v252_v2 = vsub.s32 0, %v251_v1  ;;  %v256_v3 = vsub.s32 1, %v251_v1  ;;  %v247_v7 = vld [vmem:[%s222_s17] sm:$0xff] }
  0x12   : > { %v253_v5 = vrot.slane %v248_v4, %v252_v2  ;;  %v257_v6 = vrot.slane %v248_v4, %v256_v3 }
  0x14   : > { %v258_v8 = vcombine.low %v253_v5, %v257_v6 }
  0x16   : > { %v260_v9 = vmul.f32 %v258_v8, %v247_v7 }
  0x18   : > { %261 = vst [vmem:[%s245_s23] sm:$0xff] %v260_v9 }
  0x19 PF: > { %s12_s11 = sadd.s32 1, %s449_s11   ;;  %s502_s9 = smov %s445_s10 }
  0x1a   : > { %p9_p5 = scmp.ge.s32.totalorder %s12_s11, 4   ;;  %s503_s10 = smov %s505_s12 }
  0x1c   :  { %11 = sbr.rel (!%p9_p5) target bundleno = 2 (0x2), region = 61 }

// kernel: dropblock2d.2
= control target key start
LH: loop header
LB: loop body
LE: loop exit
PB: predicated region body
PF: predicated region fallthrough
CT: control target
= control target key end

     0   :  { %vm20_vm0 = vcmask 1046528   ;;  %vm39_vm1 = vcmask 1045504   ;;  %vm58_vm2 = vcmask 1044480   ;;  %vm77_vm3 = vcmask 1043456   ;;  %s286_s18 = smov 127   ;;  %s288_s19 = smov 125   ;;  %s429_s0 = inlined_call_operand.vmem [shape: f32[2,22,22], index: 0, kind: input, shape index: {}]   ;;  %s430_s1 = inlined_call_operand.vmem [shape: f32[2,16,16], index: 1, kind: output, shape index: {}]  }
   0x1   :  { %v11_v0 = vld [vmem:[%s429_s0 + $0x18] sm:$0xff]  ;;  %v309_v1 = vld [vmem:[%s429_s0 + $0x20] sm:$0xff]  ;;  %vm96_vm4 = vcmask 1042432   ;;  %v321_v11 = vld [vmem:[%s429_s0 + $0x8] sm:$0xff]  ;;  %vm115_vm5 = vcmask 1041408   ;;  %s289_s20 = smov 124  }
   0x2   :  { %v26_v2 = vrot.slane %v11_v0, 1  ;;  %v27_v3 = vrot.slane %v309_v1, 1  ;;  %v45_v4 = vrot.slane %v11_v0, 2  ;;  %v46_v5 = vrot.slane %v309_v1, 2  ;;  %v8_v10 = vld [vmem:[%s429_s0] sm:$0xff]  ;;  %s290_s21 = smov 123  }
   0x3   :  { %v64_v6 = vrot.slane %v11_v0, 3  ;;  %v65_v7 = vrot.slane %v309_v1, 3  ;;  %v83_v8 = vrot.slane %v11_v0, 4  ;;  %v84_v9 = vrot.slane %v309_v1, 4  ;;  %v10_v35 = vld [vmem:[%s429_s0 + $0x10] sm:$0x3f] }
   0x4   :  { %v28_v12 = vsel %vm20_vm0, %v26_v2, %v27_v3  ;;  %v47_v13 = vsel %vm39_vm1, %v45_v4, %v46_v5  ;;  %v102_v14 = vrot.slane %v11_v0, 5  ;;  %v103_v15 = vrot.slane %v309_v1, 5  ;;  %v13_v51 = vld [vmem:[%s429_s0 + $0x28] sm:$0x3f]  ;;  %s287_s0 = smov 126   ;;  %s291_s22 = smov 122  }
   0x5   :  { %v37_v16 = vmax.f32 %v11_v0, %v28_v12  ;;  %v66_v17 = vsel %vm58_vm2, %v64_v6, %v65_v7  ;;  %v85_v18 = vsel %vm77_vm3, %v83_v8, %v84_v9  ;;  %v121_v19 = vrot.slane %v11_v0, 6  ;;  %s292_s24 = smov 1.0  }
   0x6   :  { %v122_v20 = vrot.slane %v309_v1, 6  ;;  %v21_v21 = vrot.slane %v8_v10, 1  ;;  %v22_v22 = vrot.slane %v321_v11, 1  ;;  %v40_v24 = vrot.slane %v8_v10, 2 }
   0x7   :  { %v56_v23 = vmax.f32 %v37_v16, %v47_v13  ;;  %v41_v25 = vrot.slane %v321_v11, 2  ;;  %v59_v26 = vrot.slane %v8_v10, 3  ;;  %v104_v27 = vsel %vm96_vm4, %v102_v14, %v103_v15 }
   0x8   :  { %v23_v28 = vsel %vm20_vm0, %v21_v21, %v22_v22  ;;  %v60_v29 = vrot.slane %v321_v11, 3  ;;  %v78_v30 = vrot.slane %v8_v10, 4  ;;  %v79_v34 = vrot.slane %v321_v11, 4 }
   0x9   :  { %v75_v31 = vmax.f32 %v56_v23, %v66_v17  ;;  %v35_v32 = vmax.f32 %v8_v10, %v23_v28  ;;  %v42_v33 = vsel %vm39_vm1, %v40_v24, %v41_v25  ;;  %v123_v36 = vsel %vm115_vm5, %v121_v19, %v122_v20 }
   0xa   :  { %v61_v37 = vsel %vm58_vm2, %v59_v26, %v60_v29  ;;  %v97_v38 = vrot.slane %v8_v10, 5  ;;  %v98_v39 = vrot.slane %v321_v11, 5  ;;  %v116_v42 = vrot.slane %v8_v10, 6 }
   0xb   :  { %v94_v40 = vmax.f32 %v75_v31, %v85_v18  ;;  %v54_v41 = vmax.f32 %v35_v32, %v42_v33  ;;  %v117_v43 = vrot.slane %v321_v11, 6  ;;  %v80_v44 = vsel %vm77_vm3, %v78_v30, %v79_v34 }
   0xc   :  { %v24_v45 = vrot.slane %v10_v35, 1  ;;  %v43_v46 = vrot.slane %v10_v35, 2  ;;  %v62_v47 = vrot.slane %v10_v35, 3  ;;  %v81_v50 = vrot.slane %v10_v35, 4 }
   0xd   :  { %v113_v48 = vmax.f32 %v94_v40, %v104_v27  ;;  %v73_v49 = vmax.f32 %v54_v41, %v61_v37  ;;  %v99_v52 = vsel %vm96_vm4, %v97_v38, %v98_v39  ;;  %v118_v57 = vsel %vm115_vm5, %v116_v42, %v117_v43 }
   0xe   :  { %v25_v53 = vsel %vm20_vm0, %v22_v22, %v24_v45  ;;  %v44_v54 = vsel %vm39_vm1, %v41_v25, %v43_v46  ;;  %v63_v59 = vsel %vm58_vm2, %v60_v29, %v62_v47  ;;  %v100_v60 = vrot.slane %v10_v35, 5 }
   0xf   :  { %v362_v55 = vmax.f32 %v113_v48, %v123_v36  ;;  %v92_v56 = vmax.f32 %v73_v49, %v80_v44  ;;  %v36_v58 = vmax.f32 %v321_v11, %v25_v53  ;;  %v29_v61 = vrot.slane %v13_v51, 1 }
  0x10   :  { %v48_v62 = vrot.slane %v13_v51, 2  ;;  %v82_v2 = vsel %vm77_vm3, %v79_v34, %v81_v50  ;;  %v67_v4 = vrot.slane %v13_v51, 3  ;;  %v119_v6 = vrot.slane %v10_v35, 6 }
  0x11   :  { %142 = vrot.lane.b32.xlu1 %v362_v55, %s286_s18  ;;  %v111_v63 = vmax.f32 %v92_v56, %v99_v52  ;;  %v55_v0 = vmax.f32 %v36_v58, %v44_v54  ;;  %v30_v8 = vsel %vm20_vm0, %v27_v3, %v29_v61  ;;  %v86_v11 = vrot.slane %v13_v51, 4 }
  0x12   :  { %v49_v10 = vsel %vm39_vm1, %v46_v5, %v48_v62  ;;  %v38_v14 = vmax.f32 %v309_v1, %v30_v8  ;;  %v101_v16 = vsel %vm96_vm4, %v98_v39, %v100_v60  ;;  %v68_v17 = vsel %vm58_vm2, %v65_v7, %v67_v4 }
  0x13   :  { %v376_v12 = vmax.f32 %v111_v63, %v118_v57  ;;  %v74_v13 = vmax.f32 %v55_v0, %v63_v59  ;;  %v105_v18 = vrot.slane %v13_v51, 5  ;;  %v120_v19 = vsel %vm115_vm5, %v117_v43, %v119_v6 }
  0x14   :  { %v57_v5 = vmax.f32 %v38_v14, %v49_v10  ;;  %v87_v21 = vsel %vm77_vm3, %v84_v9, %v86_v11  ;;  %v124_v22 = vrot.slane %v13_v51, 6  ;;  %vm238_vm6 = vcmask 130048  }
  0x15   :  { %138 = vrot.lane.b32.xlu0 %v376_v12, %s286_s18  ;;  %154 = vrot.lane.b32.xlu1 %v376_v12, %s287_s0  ;;  %v93_v3 = vmax.f32 %v74_v13, %v82_v2  ;;  %v106_v7 = vsel %vm96_vm4, %v103_v15, %v105_v18 }
  0x16   :  { %v76_v24 = vmax.f32 %v57_v5, %v68_v17  ;;  %v125_v27 = vsel %vm115_vm5, %v122_v20, %v124_v22 }
  0x17   :  { %v112_v23 = vmax.f32 %v93_v3, %v101_v16 }
  0x18   :  { %v95_v26 = vmax.f32 %v76_v24, %v87_v21 }
  0x19   :  { %v131_v25 = vmax.f32 %v112_v23, %v120_v19 }
  0x1a   :  { %v114_v28 = vmax.f32 %v95_v26, %v106_v7 }
  0x1b   :  { %140 = vrot.lane.b32.xlu0 %v131_v25, %s286_s18 }
  0x1c   :  { %v133_v29 = vmax.f32 %v114_v28, %v125_v27 }
  0x1e   :  { %144 = vrot.lane.b32.xlu1 %v133_v29, %s286_s18 }
  0x1f   :  { %156 = vrot.lane.b32.xlu0 %v131_v25, %s287_s0 }
  0x22   :  { %170 = vrot.lane.b32.xlu1 %v376_v12, %s288_s19 }
  0x23   :  { %158 = vrot.lane.b32.xlu0 %v362_v55, %s287_s0 }
  0x26   :  { %160 = vrot.lane.b32.xlu1 %v133_v29, %s287_s0 }
  0x27   :  { %172 = vrot.lane.b32.xlu0 %v131_v25, %s288_s19 }
  0x2a   :  { %186 = vrot.lane.b32.xlu1 %v376_v12, %s289_s20 }
  0x2b   :  { %174 = vrot.lane.b32.xlu0 %v362_v55, %s288_s19 }
  0x2e   :  { %176 = vrot.lane.b32.xlu1 %v133_v29, %s288_s19 }
  0x2f   :  { %188 = vrot.lane.b32.xlu0 %v131_v25, %s289_s20 }
  0x32   :  { %202 = vrot.lane.b32.xlu1 %v376_v12, %s290_s21 }
  0x33   :  { %190 = vrot.lane.b32.xlu0 %v362_v55, %s289_s20 }
  0x36   :  { %192 = vrot.lane.b32.xlu1 %v133_v29, %s289_s20 }
  0x37   :  { %204 = vrot.lane.b32.xlu0 %v131_v25, %s290_s21 }
  0x3a   :  { %218 = vrot.lane.b32.xlu1 %v376_v12, %s291_s22 }
  0x3b   :  { %206 = vrot.lane.b32.xlu0 %v362_v55, %s290_s21 }
  0x3e   :  { %208 = vrot.lane.b32.xlu1 %v133_v29, %s290_s21 }
  0x3f   :  { %220 = vrot.lane.b32.xlu0 %v131_v25, %s291_s22 }
  0x42   :  { %224 = vrot.lane.b32.xlu1 %v133_v29, %s291_s22 }
  0x43   :  { %222 = vrot.lane.b32.xlu0 %v362_v55, %s291_s22 }
  0x83   :  { %v143_v1 = vpop.permute.xlu1 %142 }
  0x84   :  { %v152_v49 = vmax.f32 %v362_v55, %v143_v1 }
  0x87   :  { %v139_v9 = vpop.permute.xlu0 %138  ;;  %v155_v15 = vpop.permute.xlu1 %154 }
  0x88   :  { %v150_v42 = vmax.f32 %v376_v12, %v139_v9 }
  0x8a   :  { %v166_v43 = vmax.f32 %v150_v42, %v155_v15 }
  0x8d   :  { %v141_v20 = vpop.permute.xlu0 %140 }
  0x8e   :  { %v151_v44 = vmax.f32 %v131_v25, %v141_v20 }
  0x90   :  { %v145_v30 = vpop.permute.xlu1 %144 }
  0x91   :  { %v157_v31 = vpop.permute.xlu0 %156  ;;  %v153_v50 = vmax.f32 %v133_v29, %v145_v30 }
  0x92   :  { %v167_v47 = vmax.f32 %v151_v44, %v157_v31 }
  0x94   :  { %v171_v32 = vpop.permute.xlu1 %170 }
  0x95   :  { %v159_v33 = vpop.permute.xlu0 %158  ;;  %v182_v48 = vmax.f32 %v166_v43, %v171_v32 }
  0x96   :  { %v168_v56 = vmax.f32 %v152_v49, %v159_v33 }
  0x98   :  { %v161_v34 = vpop.permute.xlu1 %160 }
  0x99   :  { %v173_v35 = vpop.permute.xlu0 %172  ;;  %v169_v57 = vmax.f32 %v153_v50, %v161_v34 }
  0x9a   :  { %v183_v51 = vmax.f32 %v167_v47, %v173_v35 }
  0x9c   :  { %v187_v36 = vpop.permute.xlu1 %186 }
  0x9d   :  { %v175_v37 = vpop.permute.xlu0 %174  ;;  %v198_v52 = vmax.f32 %v182_v48, %v187_v36 }
  0x9e   :  { %v184_v60 = vmax.f32 %v168_v56, %v175_v37 }
  0xa0   :  { %v177_v38 = vpop.permute.xlu1 %176 }
  0xa1   :  { %v189_v39 = vpop.permute.xlu0 %188  ;;  %v185_v61 = vmax.f32 %v169_v57, %v177_v38 }
  0xa2   :  { %v199_v58 = vmax.f32 %v183_v51, %v189_v39 }
  0xa4   :  { %v203_v40 = vpop.permute.xlu1 %202 }
  0xa5   :  { %v191_v41 = vpop.permute.xlu0 %190  ;;  %v214_v59 = vmax.f32 %v198_v52, %v203_v40 }
  0xa6   :  { %v200_v4 = vmax.f32 %v184_v60, %v191_v41 }
  0xa8   :  { %v193_v45 = vpop.permute.xlu1 %192 }
  0xa9   :  { %v205_v46 = vpop.permute.xlu0 %204  ;;  %v201_v6 = vmax.f32 %v185_v61, %v193_v45 }
  0xaa   :  { %v215_v62 = vmax.f32 %v199_v58, %v205_v46 }
  0xac   :  { %v219_v53 = vpop.permute.xlu1 %218 }
  0xad   :  { %v207_v54 = vpop.permute.xlu0 %206  ;;  %v230_v63 = vmax.f32 %v214_v59, %v219_v53 }
  0xae   :  { %v216_v55 = vmax.f32 %v200_v4, %v207_v54 }
  0xaf   :  { %v234_v10 = vsub.f32 1.0, %v230_v63 }
  0xb0   :  { %v209_v0 = vpop.permute.xlu1 %208 }
  0xb1   :  { %v221_v2 = vpop.permute.xlu0 %220  ;;  %v217_v11 = vmax.f32 %v201_v6, %v209_v0  ;;  %v239_v3 = vsel %vm238_vm6, %v234_v10, 0.0 }
  0xb2   :  { %v231_v8 = vmax.f32 %v215_v62, %v221_v2 }
  0xb4   :  { %v235_v12 = vsub.f32 1.0, %v231_v8  ;;  %v225_v13 = vpop.permute.xlu1 %224 }
  0xb5   :  { %v223_v14 = vpop.permute.xlu0 %222  ;;  %v233_v17 = vmax.f32 %v217_v11, %v225_v13 }
  0xb6   :  { %v240_v16 = vsel %vm238_vm6, %v235_v12, 0.0  ;;  %v232_v18 = vmax.f32 %v216_v55, %v223_v14 }
  0xb7   :  { %v237_v5 = vsub.f32 1.0, %v233_v17  ;;  %v241_v21 = vadd.f32 %v240_v16, %v239_v3 }
  0xb8   :  { %v236_v19 = vsub.f32 1.0, %v232_v18 }
  0xb9   :  { %v244_v24 = vsel %vm238_vm6, %v237_v5, 0.0 }
  0xba   :  { %v242_v22 = vsel %vm238_vm6, %v236_v19, 0.0 }
  0xbb   :  { %v243_v23 = vadd.f32 %v242_v22, %v241_v21 }
  0xbd   :  { %v245_v7 = vadd.f32 %v244_v24, %v243_v23 }
  0xbf   :  { %246 = vadd.xlane.f32.xlu0 %v245_v7 }
 0x148   :  { %v247_v25 = vpop.xlane.xlu0 %246 }
 0x149   :  { %v248_v26 = vrot.slane %v247_v25, 4 }
 0x14b   :  { %v249_v27 = vadd.f32 %v248_v26, %v247_v25 }
 0x14d   :  { %v250_v28 = vrot.slane %v249_v27, 2 }
 0x14f   :  { %v251_v29 = vadd.f32 %v250_v28, %v249_v27 }
 0x151   :  { %v252_v1 = vrot.slane %v251_v29, 1 }
 0x153   :  { %v253_v9 = vadd.f32 %v252_v1, %v251_v29 }
 0x155   :  { %273 = vpush %v253_v9 }
 0x186   :  { %s274_s23 = spop %273 }
 0x187   :  { %s255_s25 = smax.f32 %s292_s24, %s274_s23 }
 0x188   :  { %v256_v15 = vstv %s255_s25 }
 0x189   :  { %284 = vrcp.f32 %v256_v15 }
 0x196   :  { %v285_v20 = vpop.eup %284 }
 0x197   :  { %275 = vpush %v285_v20 }
 0x1c8   :  { %s276_s26 = spop %275 }
 0x1c9   :  { %s259_s27 = smul.f32 512.0, %s276_s26 }
 0x1cb   :  { %v260_v30 = vstv %s259_s27 }
 0x1cc   :  { %v261_v31 = vmul.f32 %v260_v30, %v234_v10  ;;  %v262_v32 = vmul.f32 %v260_v30, %v235_v12  ;;  %v263_v33 = vmul.f32 %v260_v30, %v236_v19  ;;  %v264_v34 = vmul.f32 %v260_v30, %v237_v5 }
 0x1ce   :  { %265 = vst.msk [vmem:[%s430_s1] sm:$0xff] %vm238_vm6, %v261_v31  ;;  %266 = vst.msk [vmem:[%s430_s1 + $0x8] sm:$0xff] %vm238_vm6, %v262_v32 }
 0x1cf   :  { %267 = vst.msk [vmem:[%s430_s1 + $0x10] sm:$0xff] %vm238_vm6, %v263_v33  ;;  %268 = vst.msk [vmem:[%s430_s1 + $0x18] sm:$0xff] %vm238_vm6, %v264_v34 }

</bundles_post_ra>
